<compile_context>
chip_gen: v7x
topology: tpu7x:2x2x1
jax: 0.10.0
libtpu: 0.0.40
codegen_flags: <defaults>
</compile_context>

<pallas_src>
import functools
import math

import jax
import jax.numpy as jnp
from jax.experimental import pallas as pl
from jax.experimental.pallas import tpu as pltpu

LANES = 128
SUBLANES = 8
GRANULE = SUBLANES * LANES  # 1024 elements


@functools.lru_cache(maxsize=None)
def _detect_num_cores():
    """Number of TensorCores a single pallas_call can shard across."""
    try:
        kind = jax.devices()[0].device_kind.lower()
    except Exception:  # pragma: no cover - defensive
        return 1
    # v7x exposes 2 TensorCores per device; v5e/v6e have one.
    if "v7" in kind:
        return 2
    return 1


def _rmse_partial_kernel(yhat_ref, y_ref, out_ref, *, block_rows, acc_rows,
                         rows_valid, blocks_per_core, need_mask,
                         sub_in_native):
    c = pl.program_id(0)   # core-partition index
    i = pl.program_id(1)   # reduction index ("arbitrary")

    # Output block (1, acc_rows, 128) is resident across the reduction axis:
    # initialize it on the first step of each core-partition sweep.
    @pl.when(i == 0)
    def _():
        out_ref[...] = jnp.zeros_like(out_ref)

    if sub_in_native:
        # bf16 VALU subtract, then a single upcast (saves one cast/element).
        d = (yhat_ref[...] - y_ref[...]).astype(jnp.float32)
    else:
        d = yhat_ref[...].astype(jnp.float32) - y_ref[...].astype(jnp.float32)
    d2 = d * d

    def fold(x):
        # (block_rows, 128) -> (1, acc_rows, 128). acc_rows/8 output vregs
        # give that many independent accumulate chains (not latency-bound).
        p = x.reshape(block_rows // acc_rows, acc_rows, LANES).sum(axis=0)
        return p.reshape(1, acc_rows, LANES)

    if need_mask:
        gb = c * blocks_per_core + i
        crosses = (gb + 1) * block_rows > rows_valid

        # Fast path: interior blocks accumulate unmasked.
        @pl.when(jnp.logical_not(crosses))
        def _():
            out_ref[...] += fold(d2)

        # Slow path: only blocks that reach past rows_valid (overhanging tail
        # block and/or clamped duplicate blocks from the core split).
        @pl.when(crosses)
        def _():
            row = jax.lax.broadcasted_iota(jnp.int32, (block_rows, LANES), 0)
            global_row = row + gb * block_rows
            d2m = jnp.where(global_row < rows_valid, d2, jnp.float32(0.0))
            out_ref[...] += fold(d2m)
    else:
        out_ref[...] += fold(d2)


def rmse_loss(yhat, y, eps=1e-09, block_rows=None, num_cores=None):
    assert yhat.shape == y.shape, "yhat and y must have the same shape"
    n_elems = math.prod(yhat.shape)

    yhat_f = jnp.ravel(yhat)
    y_f = jnp.ravel(y)

    # Kernel consumes only the 1024-aligned prefix (no jnp.pad copy); the
    # ragged tail (<= 1023 elements) is reduced with plain jnp below.
    n_main = (n_elems // GRANULE) * GRANULE

    if n_main == 0:
        d = yhat_f.astype(jnp.float32) - y_f.astype(jnp.float32)
        total = jnp.sum(d * d)
        return jnp.sqrt(total / jnp.float32(n_elems) + jnp.float32(eps))

    rows = n_main // LANES  # multiple of 8

    itemsize = jnp.dtype(yhat.dtype).itemsize
    if block_rows is None:
        # ~2 MiB of input per array per grid step (4096 rows f32 / 8192 bf16).
        block_rows = max(SUBLANES, (2 << 20) // (LANES * itemsize))
    block_rows = min(block_rows, rows)
    block_rows = max(SUBLANES, (block_rows // SUBLANES) * SUBLANES)
    assert block_rows % SUBLANES == 0

    # Resident accumulator height: 64 rows -> 8 independent vreg add chains.
    acc_rows = SUBLANES
    for cand in (64, 32, 16, 8):
        if block_rows % cand == 0:
            acc_rows = cand
            break

    if num_cores is None:
        num_cores = _detect_num_cores()
    num_blocks = pl.cdiv(rows, block_rows)
    num_cores = max(1, min(num_cores, num_blocks))
    blocks_per_core = pl.cdiv(num_blocks, num_cores)
    total_blocks = num_cores * blocks_per_core
    # Mask only when some grid block reaches past the valid rows.
    need_mask = (total_blocks * block_rows) != rows

    sub_in_native = (yhat.dtype == jnp.bfloat16) and (y.dtype == jnp.bfloat16)

    yhat2d = yhat_f[:n_main].reshape(rows, LANES)
    y2d = y_f[:n_main].reshape(rows, LANES)

    def in_map(c, i):
        # Clamp so duplicated blocks (core-split remainder) read a valid
        # block; their contribution is zeroed by the in-kernel mask.
        gb = jnp.minimum(c * blocks_per_core + i, num_blocks - 1)
        return (gb, 0)

    kernel = functools.partial(
        _rmse_partial_kernel,
        block_rows=block_rows,
        acc_rows=acc_rows,
        rows_valid=rows,
        blocks_per_core=blocks_per_core,
        need_mask=need_mask,
        sub_in_native=sub_in_native,
    )

    def run(dim_sems):
        return pl.pallas_call(
            kernel,
            out_shape=jax.ShapeDtypeStruct((num_cores, acc_rows, LANES),
                                           jnp.float32),
            grid_spec=pltpu.PrefetchScalarGridSpec(
                num_scalar_prefetch=0,
                grid=(num_cores, blocks_per_core),
                in_specs=[
                    pl.BlockSpec((block_rows, LANES), in_map),
                    pl.BlockSpec((block_rows, LANES), in_map),
                ],
                out_specs=pl.BlockSpec((1, acc_rows, LANES),
                                       lambda c, i: (c, 0, 0)),
            ),
            compiler_params=pltpu.CompilerParams(
                dimension_semantics=dim_sems,
                vmem_limit_bytes=32 * 1024 * 1024,
            ),
        )(yhat2d, y2d)

    if num_cores > 1:
        core_parallel = getattr(pltpu, "CORE_PARALLEL", None)
        arbitrary = getattr(pltpu, "ARBITRARY", "arbitrary")
        try:
            if core_parallel is None:
                raise ValueError("CORE_PARALLEL unavailable in this build")
            partials = run((core_parallel, arbitrary))
        except Exception:
            # Fall back to plain "parallel" sharding if CORE_PARALLEL is
            # rejected by this jax/libtpu build.
            partials = run(("parallel", "arbitrary"))
    else:
        partials = run(("arbitrary", "arbitrary"))

    # Tiny follow-up combine (num_cores * acc_rows * 128 floats).
    total = jnp.sum(partials, dtype=jnp.float32)

    if n_main < n_elems:
        td = (yhat_f[n_main:].astype(jnp.float32)
              - y_f[n_main:].astype(jnp.float32))
        total = total + jnp.sum(td * td)

    return jnp.sqrt(total / jnp.float32(n_elems) + jnp.float32(eps))


if __name__ == "__main__":
    key = jax.random.PRNGKey(0)
    k1, k2, k3, k4 = jax.random.split(key, 4)

    # NCHW-style small inputs, consistent with typical regression targets.
    yhat = jax.random.normal(k1, (2, 4, 16, 16), dtype=jnp.float32)
    y = jax.random.normal(k2, (2, 4, 16, 16), dtype=jnp.float32)

    loss = rmse_loss(yhat, y)
    jax.block_until_ready(loss)
    ref = jnp.sqrt(jnp.mean((yhat - y) ** 2) + 1e-09)
    assert jnp.allclose(loss, ref, rtol=1e-5, atol=1e-6), (loss, ref)

    # Second check exercising the gated tail-mask path (rows not a multiple
    # of block_rows) with an explicit small block size.
    yhat2 = jax.random.normal(k3, (40, 128), dtype=jnp.float32)
    y2 = jax.random.normal(k4, (40, 128), dtype=jnp.float32)
    loss2 = rmse_loss(yhat2, y2, block_rows=16)
    jax.block_until_ready(loss2)
    ref2 = jnp.sqrt(jnp.mean((yhat2 - y2) ** 2) + 1e-09)
    assert jnp.allclose(loss2, ref2, rtol=1e-5, atol=1e-6), (loss2, ref2)

    print("KERNEL_OK")
</pallas_src>

<mosaic_0001>
module attributes {stable_mosaic.version = 11 : i64} {
  func.func @_rmse_partial_kernel(%arg0: i32, %arg1: i32, %arg2: memref<16x128xf32, #tpu.memory_space<vmem>>, %arg3: memref<16x128xf32, #tpu.memory_space<vmem>>, %arg4: memref<1x16x128xf32, #tpu.memory_space<vmem>>) attributes {dimension_semantics = [#tpu.dimension_semantics<arbitrary>, #tpu.dimension_semantics<arbitrary>], iteration_bounds = array<i64: 1, 1>, scalar_prefetch = 0 : i64, scratch_operands = 0 : i64, tpu.core_type = #tpu.core_type<tc>, window_params = [{transform_indices = @transform_0, window_bounds = array<i64: 16, 128>}, {transform_indices = @transform_1, window_bounds = array<i64: 16, 128>}, {transform_indices = @transform_2, window_bounds = array<i64: 1, 16, 128>}]} {
    %c0_i32 = arith.constant 0 : i32
    %0 = arith.cmpi eq, %arg1, %c0_i32 : i32
    %1 = arith.extui %0 : i1 to i32
    %c0_i32_0 = arith.constant 0 : i32
    %2 = arith.cmpi ne, %1, %c0_i32_0 : i32
    scf.if %2 {
      %cst_10 = arith.constant 0.000000e+00 : f32
      %13 = vector.broadcast %cst_10 : f32 to vector<1x16x128xf32>
      %c0_11 = arith.constant 0 : index
      %c0_12 = arith.constant 0 : index
      %c0_13 = arith.constant 0 : index
      %14 = vector.load %arg4[%c0_11, %c0_12, %c0_13] : memref<1x16x128xf32, #tpu.memory_space<vmem>>, vector<1x16x128xf32>
      tpu.vector_store %arg4[%c0_11, %c0_12, %c0_13], %13 {strides = array<i32>} : memref<1x16x128xf32, #tpu.memory_space<vmem>>, vector<1x16x128xf32>,
    } else {
    }
    %c0 = arith.constant 0 : index
    %c0_1 = arith.constant 0 : index
    %3 = vector.load %arg2[%c0, %c0_1] : memref<16x128xf32, #tpu.memory_space<vmem>>, vector<16x128xf32>
    %c0_2 = arith.constant 0 : index
    %c0_3 = arith.constant 0 : index
    %4 = vector.load %arg3[%c0_2, %c0_3] : memref<16x128xf32, #tpu.memory_space<vmem>>, vector<16x128xf32>
    %5 = arith.subf %3, %4 : vector<16x128xf32>
    %6 = arith.mulf %5, %5 : vector<16x128xf32>
    %c0_4 = arith.constant 0 : index
    %c0_5 = arith.constant 0 : index
    %c0_6 = arith.constant 0 : index
    %7 = vector.load %arg4[%c0_4, %c0_5, %c0_6] : memref<1x16x128xf32, #tpu.memory_space<vmem>>, vector<1x16x128xf32>
    %8 = vector.shape_cast %6 : vector<16x128xf32> to vector<1x16x128xf32>
    %cst = arith.constant dense<0.000000e+00> : vector<16x128xf32>
    %9 = vector.multi_reduction <add>, %8, %cst [0] : vector<1x16x128xf32> to vector<16x128xf32>
    %10 = vector.shape_cast %9 : vector<16x128xf32> to vector<1x16x128xf32>
    %11 = arith.addf %7, %10 : vector<1x16x128xf32>
    %c0_7 = arith.constant 0 : index
    %c0_8 = arith.constant 0 : index
    %c0_9 = arith.constant 0 : index
    %12 = vector.load %arg4[%c0_7, %c0_8, %c0_9] : memref<1x16x128xf32, #tpu.memory_space<vmem>>, vector<1x16x128xf32>
    tpu.vector_store %arg4[%c0_7, %c0_8, %c0_9], %11 {strides = array<i32>} : memref<1x16x128xf32, #tpu.memory_space<vmem>>, vector<1x16x128xf32>,
    return
  }
  func.func @transform_0(%arg0: i32, %arg1: i32) -> (i32, i32) {
    %c1_i32 = arith.constant 1 : i32
    %0 = arith.muli %arg0, %c1_i32 : i32
    %1 = arith.addi %0, %arg1 : i32
    %c0_i32 = arith.constant 0 : i32
    %2 = arith.minsi %1, %c0_i32 : i32
    %c0_i32_0 = arith.constant 0 : i32
    %c0_i32_1 = arith.constant 0 : i32
    return %2, %c0_i32_0 : i32, i32
  }
  func.func @transform_1(%arg0: i32, %arg1: i32) -> (i32, i32) {
    %c1_i32 = arith.constant 1 : i32
    %0 = arith.muli %arg0, %c1_i32 : i32
    %1 = arith.addi %0, %arg1 : i32
    %c0_i32 = arith.constant 0 : i32
    %2 = arith.minsi %1, %c0_i32 : i32
    %c0_i32_0 = arith.constant 0 : i32
    %c0_i32_1 = arith.constant 0 : i32
    return %2, %c0_i32_0 : i32, i32
  }
  func.func @transform_2(%arg0: i32, %arg1: i32) -> (i32, i32, i32) {
    %c0_i32 = arith.constant 0 : i32
    %c0_i32_0 = arith.constant 0 : i32
    %c0_i32_1 = arith.constant 0 : i32
    return %arg0, %c0_i32, %c0_i32_0 : i32, i32, i32
  }
}

</mosaic_0001>

<bundles_post_ra>
// kernel: tpu_custom_call.1
= control target key start
LH: loop header
LB: loop body
LE: loop exit
PB: predicated region body
PF: predicated region fallthrough
CT: control target
= control target key end

     0   :  { %7 = vsyncpa [#allocation3], 0  ;;  %s247_s0 = inlined_call_operand.hbm [shape: f32[16,128], index: 0, kind: input, shape index: {}]   ;;  %s248_s1 = inlined_call_operand.hbm [shape: f32[16,128], index: 1, kind: input, shape index: {}]   ;;  %s249_s2 = inlined_call_operand.hbm [shape: f32[1,16,128], index: 2, kind: output, shape index: {}]  }
   0x1   :  { %8 = vsyncpa [#allocation6], 0 }
   0x2   :  { %9 = vsyncpa [#allocation4], 0  ;;  %s182_s9 = smov [#allocation2]   ;;  %s110_s13 = scalar_lea.hbm %s247_s0, 256 }
   0x3   :  { %s21_s10 = sshll.u32 %s182_s9, 4  ;;  %p111_p0 = scmp.ne.s32.totalorder %s247_s0, %s110_s13  ;;  %s22_s10 = int_to_ptr.vmem [resolvable:$true] %s21_s10 }
   0x4   :  { %p114_p1 = scmp.lt.u32.totalorder %s110_s13, %s247_s0 }
   0x6   :  { %p116_p2 = pnand %p114_p1, %p111_p0 }
   0x8   :  { %119 = shalt.err (!%p116_p2)
}
   0x9   :  { %s120_s18 = scalar_lea.vmem %s22_s10, 256  ;;  %p125_p4 = scmp.lt.s32.totalorder %s22_s10, %s22_s10 }
   0xa   :  { %p121_p3 = scmp.ne.s32.totalorder %s22_s10, %s120_s18  ;;  %p126_p5 = scmp.lt.s32.totalorder %s120_s18, %s120_s18 }
   0xc   :  { %p127_p6 = por %p126_p5, %p125_p4 }
   0xe   :  { %p128_p7 = pnand %p127_p6, %p121_p3 }
  0x10   :  { %131 = shalt.err (!%p128_p7)
}
  0x11   :  { %s183_s19 = smov 128   ;;  %s184_s20 = smov 8  }
  0x12   :  { %27 = dma.hbm_to_vmem [thread:$0]  %s247_s0, 256, %s22_s10, [#allocation3], %s183_s19, %s183_s19, %s184_s20  }
  0x13   :  { %s185_s23 = smov [#allocation5]   ;;  %s132_s27 = scalar_lea.hbm %s248_s1, 256 }
  0x14   :  { %s39_s24 = sshll.u32 %s185_s23, 4  ;;  %p133_p8 = scmp.ne.s32.totalorder %s248_s1, %s132_s27  ;;  %s40_s24 = int_to_ptr.vmem [resolvable:$true] %s39_s24 }
  0x15   :  { %p136_p9 = scmp.lt.u32.totalorder %s132_s27, %s248_s1 }
  0x17   :  { %p138_p10 = pnand %p136_p9, %p133_p8 }
  0x19   :  { %141 = shalt.err (!%p138_p10)
}
  0x1a   :  { %s142_s4 = scalar_lea.vmem %s40_s24, 256  ;;  %p147_p12 = scmp.lt.s32.totalorder %s40_s24, %s40_s24 }
  0x1b   :  { %p143_p11 = scmp.ne.s32.totalorder %s40_s24, %s142_s4  ;;  %p148_p13 = scmp.lt.s32.totalorder %s142_s4, %s142_s4 }
  0x1d   :  { %p149_p0 = por %p148_p13, %p147_p12 }
  0x1f   :  { %p150_p1 = pnand %p149_p0, %p143_p11 }
  0x21   :  { %153 = shalt.err (!%p150_p1)
}
  0x22   :  { %45 = dma.hbm_to_vmem [thread:$0]  %s248_s1, 256, %s40_s24, [#allocation6], %s183_s19, %s183_s19, %s184_s20  }
  0x23   :  { %176 = dma.done.wait [#allocation3], 256  }
  0x24   :  { %177 = vsyncadd [#allocation3], 4294967040 }
  0x25   :  { %178 = dma.done.wait [#allocation6], 256  }
  0x26   :  { %179 = vsyncadd [#allocation6], 4294967040  ;;  %v66_v0 = vld [vmem:[#allocation2] sm:$0xff]  ;;  %v68_v1 = vld [vmem:[#allocation5] sm:$0xff]  ;;  %s186_s6 = smov [#allocation7]  }
  0x27   :  { %v67_v2 = vld [vmem:[#allocation2 + $0x8] sm:$0xff]  ;;  %v70_v3 = vsub.f32 %v66_v0, %v68_v1  ;;  %v69_v4 = vld [vmem:[#allocation5 + $0x8] sm:$0xff]  ;;  %s87_s7 = sshll.u32 %s186_s6, 4  ;;  %s88_s7 = int_to_ptr.vmem [resolvable:$true] %s87_s7 }
  0x28   :  { %v71_v5 = vsub.f32 %v67_v2, %v69_v4  ;;  %s154_s8 = scalar_lea.vmem %s88_s7, 256  ;;  %p159_p3 = scmp.lt.s32.totalorder %s88_s7, %s88_s7 }
  0x29   :  { %v72_v6 = vmul.f32 %v70_v3, %v70_v3  ;;  %p155_p2 = scmp.ne.s32.totalorder %s88_s7, %s154_s8  ;;  %p160_p4 = scmp.lt.s32.totalorder %s154_s8, %s154_s8 }
  0x2a   :  { %v73_v7 = vmul.f32 %v71_v5, %v71_v5 }
  0x2b   :  { %80 = vst [vmem:[#allocation7] sm:$0xff] %v72_v6  ;;  %p161_p5 = por %p160_p4, %p159_p3 }
  0x2c   :  { %81 = vst [vmem:[#allocation7 + $0x8] sm:$0xff] %v73_v7 }
  0x2d   :  { %p162_p6 = pnand %p161_p5, %p155_p2 }
  0x2f   :  { %165 = shalt.err (!%p162_p6)
}
  0x30   :  { %s166_s10 = scalar_lea.hbm %s249_s2, 256 }
  0x31   :  { %p167_p7 = scmp.ne.s32.totalorder %s249_s2, %s166_s10  ;;  %p170_p8 = scmp.lt.u32.totalorder %s166_s10, %s249_s2 }
  0x33   :  { %p172_p9 = pnand %p170_p8, %p167_p7 }
  0x35   :  { %175 = shalt.err (!%p172_p9)
}
  0x36   :  { %93 = dma.vmem_to_hbm [thread:$0]  %s88_s7, 256, %s249_s2, [#allocation4], %s183_s19, %s183_s19, %s184_s20  }
  0x37   :  { %180 = dma.done.wait [#allocation4], 256  }
  0x38   :  { %181 = vsyncadd [#allocation4], 4294967040 }
  0x39   :  { %97 = vsyncpa [#allocation3], 1 }
  0x3a   :  { %98 = vsyncpa [#allocation6], 1 }
  0x3b   :  { %99 = vsyncpa [#allocation4], 1 }

</bundles_post_ra>
